<compile_context>
chip_gen: v5e
topology: v5e:2x2
jax: 0.10.0
libtpu: 0.0.40
codegen_flags: <defaults>
</compile_context>

<pallas_src>
import functools

import jax
import jax.numpy as jnp
from jax.experimental import pallas as pl
from jax.experimental.pallas import tpu as pltpu


def _downsample_kernel(x_ref, aw_ref, o_ref, *, precision):
    """x_ref: (nblk, cblk, H*W) native dtype; aw_ref: (H*W, Ho*Wo) pooling matrix with
    1/stride^2 folded in (resident); o_ref: (nblk, 2, cblk, Ho*Wo), [:,0]=pooled, [:,1]=0."""
    nblk, cblk, hw = x_ref.shape
    howo = o_ref.shape[-1]

    # One lane-dense MXU matmul performs both H- and W-pooling plus the averaging scale.
    lhs = x_ref[...].reshape(nblk * cblk, hw)            # keep native dtype (bf16 stays bf16)
    pooled = jnp.dot(lhs, aw_ref[...],
                     preferred_element_type=jnp.float32,
                     precision=precision)                # (nblk*cblk, Ho*Wo), f32 accumulate

    o_ref[:, 0, :, :] = pooled.reshape(nblk, cblk, howo).astype(o_ref.dtype)
    o_ref[:, 1, :, :] = jnp.zeros((nblk, cblk, howo), dtype=o_ref.dtype)


def _pad_to(v, m):
    return ((v + m - 1) // m) * m


def _divisors(v):
    return [d for d in range(1, v + 1) if v % d == 0]


def _vmem_capacity_bytes():
    try:
        cap = getattr(pltpu.get_tpu_info(), "vmem_capacity_bytes", None)
        if cap:
            return int(cap)
    except Exception:
        pass
    return 64 * 1024 * 1024  # conservative (v7x-sized) fallback


def _step_bytes(nblk, cblk, hw, howo, itemsize):
    """Padding-aware per-grid-step VMEM bytes: double-buffered in+out blocks + intermediates."""
    sub = max(8, 32 // max(int(itemsize), 1))            # sublane tile: 8 f32, 16 bf16, 32 int8
    in_blk = nblk * _pad_to(cblk, sub) * _pad_to(hw, 128) * itemsize
    out_blk = nblk * 2 * _pad_to(cblk, sub) * _pad_to(howo, 128) * itemsize
    acc_f32 = _pad_to(nblk * cblk, 8) * _pad_to(howo, 128) * 4
    lhs_copy = _pad_to(nblk * cblk, sub) * _pad_to(hw, 128) * itemsize  # possible reshape relayout
    return 2 * (in_blk + out_blk) + acc_f32 + lhs_copy


def _pick_blocks(n, c, hw, howo, itemsize, budget):
    """Largest (nblk, cblk) that fits `budget`; keep >=2 grid steps for v7x's two TensorCores."""
    # Channel block: whole C if it fits, else the largest divisor that is a multiple of 8
    # (keeps the (8,128) BlockSpec constraint on the second-to-last dim).
    cblk = c
    for d in [c] + [d for d in sorted(_divisors(c), reverse=True) if d < c and d % 8 == 0]:
        if _step_bytes(1, d, hw, howo, itemsize) <= budget:
            cblk = d
            break
    # Batch block: largest divisor of N that still fits the budget.
    nblk = 1
    for d in sorted(_divisors(n), reverse=True):
        if _step_bytes(d, cblk, hw, howo, itemsize) <= budget:
            nblk = d
            break
    # Keep at least 2 grid steps (when possible) so both v7x TensorCores get work.
    while (n // nblk) * (c // cblk) < 2 and nblk > 1:
        nblk = max(d for d in _divisors(n) if d < nblk)
    return nblk, cblk


def downsample_b(x, stride=2):
    """Equivalent of DownsampleB(nIn, nOut, stride).forward(x) for NCHW `x`.

    Returns (N, 2*C, H//stride, W//stride) = concat([avg_pool(x, stride), zeros], axis=1).
    """
    n, c, h, w = x.shape
    ho, wo = h // stride, w // stride
    if (h != ho * stride) or (w != wo * stride):
        # nn.AvgPool2d(stride) floors: only complete windows contribute.
        # TODO(synk): absorb this ragged-edge crop into the index_map to avoid an extra HBM copy.
        x = x[:, :, : ho * stride, : wo * stride]
        h, w = ho * stride, wo * stride

    hw, howo = h * w, ho * wo
    itemsize = int(jnp.dtype(x.dtype).itemsize)

    # Static (H*W, Ho*Wo) pooling matrix with the 1/stride^2 average folded in.
    # TODO(synk): the flattened matrix targets CIFAR-scale spatial sizes (DownsampleB's use
    # case); very large H*W would need the split H-pool / W-pool formulation instead.
    aw_dtype = x.dtype if (jnp.issubdtype(x.dtype, jnp.floating) and itemsize == 2) else jnp.float32
    flat_out = ((jnp.arange(h) // stride)[:, None] * wo
                + (jnp.arange(w) // stride)[None, :]).reshape(hw)
    aw = ((flat_out[:, None] == jnp.arange(howo)[None, :]).astype(aw_dtype)
          * jnp.asarray(1.0 / float(stride * stride), dtype=aw_dtype))

    # Generation-aware block sizing against padded VMEM footprints (64 MiB v7x, 128 MiB v5e/v6e).
    cap = _vmem_capacity_bytes()
    aw_bytes = 2 * _pad_to(hw, 8) * _pad_to(howo, 128) * int(jnp.dtype(aw_dtype).itemsize)
    budget = max(min(cap // 3, 48 * 1024 * 1024) - aw_bytes - (2 << 20), 1 << 20)
    nblk, cblk = _pick_blocks(n, c, hw, howo, itemsize, budget)

    need = _step_bytes(nblk, cblk, hw, howo, itemsize) + aw_bytes + (4 << 20)
    vmem_limit = int(min(max(need, 32 << 20), cap * 3 // 4))

    precision = (jax.lax.Precision.HIGHEST if x.dtype == jnp.float32
                 else jax.lax.Precision.DEFAULT)

    x3 = x.reshape(n, c, hw)  # free reshape on contiguous NCHW
    out = pl.pallas_call(
        functools.partial(_downsample_kernel, precision=precision),
        out_shape=jax.ShapeDtypeStruct((n, 2, c, howo), x.dtype),
        grid=(n // nblk, c // cblk),
        in_specs=[
            pl.BlockSpec((nblk, cblk, hw), lambda nn, cc: (nn, cc, 0)),
            # Constant block index -> fetched once, stays resident across the whole grid.
            pl.BlockSpec((hw, howo), lambda nn, cc: (0, 0)),
        ],
        out_specs=pl.BlockSpec((nblk, 2, cblk, howo), lambda nn, cc: (nn, 0, cc, 0)),
        compiler_params=pltpu.CompilerParams(
            dimension_semantics=("parallel", "parallel"),
            vmem_limit_bytes=vmem_limit,
        ),
    )(x3, aw)

    # (N, 2, C, Ho*Wo) -> (N, 2C, Ho, Wo) is a free contiguous reshape (no concat, no extra copy).
    return out.reshape(n, 2 * c, ho, wo)


def _reference(x, stride=2):
    n, c, h, w = x.shape
    ho, wo = h // stride, w // stride
    xc = x[:, :, : ho * stride, : wo * stride]
    pooled = xc.reshape(n, c, ho, stride, wo, stride).mean(axis=(3, 5))
    return jnp.concatenate([pooled, jnp.zeros_like(pooled)], axis=1)


if __name__ == "__main__":
    key = jax.random.PRNGKey(0)
    x = jax.random.normal(key, (2, 4, 16, 16), dtype=jnp.float32)

    out = jax.block_until_ready(downsample_b(x, stride=2))
    ref = _reference(x, stride=2)

    assert out.shape == (2, 8, 8, 8), out.shape
    assert jnp.allclose(out, ref, atol=1e-5, rtol=1e-5), "mismatch vs reference"
    print("KERNEL_OK")
</pallas_src>

<mosaic_0001>
module attributes {stable_mosaic.version = 11 : i64} {
  func.func @_downsample_kernel(%arg0: i32, %arg1: i32, %arg2: memref<1x4x256xf32, #tpu.memory_space<vmem>>, %arg3: memref<256x64xf32, #tpu.memory_space<vmem>>, %arg4: memref<1x2x4x64xf32, #tpu.memory_space<vmem>>) attributes {dimension_semantics = [#tpu.dimension_semantics<parallel>, #tpu.dimension_semantics<parallel>], iteration_bounds = array<i64: 2, 1>, scalar_prefetch = 0 : i64, scratch_operands = 0 : i64, tpu.core_type = #tpu.core_type<tc>, window_params = [{transform_indices = @transform_0, window_bounds = array<i64: 1, 4, 256>}, {pipeline_mode = #tpu.pipeline_mode<synchronous>, transform_indices = @transform_1, window_bounds = array<i64: 256, 64>}, {transform_indices = @transform_2, window_bounds = array<i64: 1, 2, 4, 64>}]} {
    %c0 = arith.constant 0 : index
    %c0_0 = arith.constant 0 : index
    %c0_1 = arith.constant 0 : index
    %0 = vector.load %arg2[%c0, %c0_0, %c0_1] : memref<1x4x256xf32, #tpu.memory_space<vmem>>, vector<1x4x256xf32>
    %1 = vector.shape_cast %0 : vector<1x4x256xf32> to vector<4x256xf32>
    %c0_2 = arith.constant 0 : index
    %c0_3 = arith.constant 0 : index
    %2 = vector.load %arg3[%c0_2, %c0_3] : memref<256x64xf32, #tpu.memory_space<vmem>>, vector<256x64xf32>
    %cst = arith.constant dense<0.000000e+00> : vector<4x64xf32>
    %3 = tpu.matmul %1, %2, %cst {dimension_numbers = #tpu.dot_dimension_numbers<[1], [0], [0], [1], [0, 0, 1, 1], [], []>, precision = #tpu.contract_precision<fp32>} : vector<4x256xf32>, vector<256x64xf32>, vector<4x64xf32> -> vector<4x64xf32>
    %4 = vector.shape_cast %3 : vector<4x64xf32> to vector<1x4x64xf32>
    %c0_4 = arith.constant 0 : index
    %c0_5 = arith.constant 0 : index
    %c0_6 = arith.constant 0 : index
    %c0_7 = arith.constant 0 : index
    %5 = vector.load %arg4[%c0_4, %c0_5, %c0_6, %c0_7] : memref<1x2x4x64xf32, #tpu.memory_space<vmem>>, vector<1x1x4x64xf32>
    %6 = vector.shape_cast %5 : vector<1x1x4x64xf32> to vector<1x4x64xf32>
    %7 = vector.shape_cast %4 : vector<1x4x64xf32> to vector<1x1x4x64xf32>
    tpu.vector_store %arg4[%c0_4, %c0_5, %c0_6, %c0_7], %7 {strides = array<i32>} : memref<1x2x4x64xf32, #tpu.memory_space<vmem>>, vector<1x1x4x64xf32>,
    %cst_8 = arith.constant 0.000000e+00 : f32
    %8 = vector.broadcast %cst_8 : f32 to vector<1x4x64xf32>
    %c0_9 = arith.constant 0 : index
    %c1 = arith.constant 1 : index
    %c0_10 = arith.constant 0 : index
    %c0_11 = arith.constant 0 : index
    %9 = vector.load %arg4[%c0_9, %c1, %c0_10, %c0_11] : memref<1x2x4x64xf32, #tpu.memory_space<vmem>>, vector<1x1x4x64xf32>
    %10 = vector.shape_cast %9 : vector<1x1x4x64xf32> to vector<1x4x64xf32>
    %11 = vector.shape_cast %8 : vector<1x4x64xf32> to vector<1x1x4x64xf32>
    tpu.vector_store %arg4[%c0_9, %c1, %c0_10, %c0_11], %11 {strides = array<i32>} : memref<1x2x4x64xf32, #tpu.memory_space<vmem>>, vector<1x1x4x64xf32>,
    return
  }
  func.func @transform_0(%arg0: i32, %arg1: i32) -> (i32, i32, i32) {
    %c0_i32 = arith.constant 0 : i32
    %c0_i32_0 = arith.constant 0 : i32
    return %arg0, %arg1, %c0_i32 : i32, i32, i32
  }
  func.func @transform_1(%arg0: i32, %arg1: i32) -> (i32, i32) {
    %c0_i32 = arith.constant 0 : i32
    %c0_i32_0 = arith.constant 0 : i32
    %c0_i32_1 = arith.constant 0 : i32
    return %c0_i32, %c0_i32_0 : i32, i32
  }
  func.func @transform_2(%arg0: i32, %arg1: i32) -> (i32, i32, i32, i32) {
    %c0_i32 = arith.constant 0 : i32
    %c0_i32_0 = arith.constant 0 : i32
    %c0_i32_1 = arith.constant 0 : i32
    return %arg0, %c0_i32, %arg1, %c0_i32_0 : i32, i32, i32, i32
  }
}

</mosaic_0001>

<bundles_post_ra>
// kernel: tpu_custom_call.1
= control target key start
LH: loop header
LB: loop body
LE: loop exit
PB: predicated region body
PF: predicated region fallthrough
CT: control target
= control target key end

     0   :  { %7 = vsyncpa [#allocation3], 0  ;;  %s1875_s0 = inlined_call_operand.vmem [shape: f32[2,4,256], index: 0, kind: input, shape index: {}]   ;;  %s1876_s1 = inlined_call_operand.vmem [shape: f32[256,64], index: 1, kind: input, shape index: {}]   ;;  %s1877_s2 = inlined_call_operand.hbm [shape: f32[2,2,4,64], index: 2, kind: output, shape index: {}]  }
   0x1   :  { %9 = vsyncpa [#allocation3 + $0x1], 0  ;;  %s1165_s9 = smov 0   ;;  %s1167_s10 = smov 0  }
   0x2   :  { %s1169_s11 = smov 0   ;;  %s1171_s12 = smov 0  }
   0x3   :  { %s1173_s13 = smov 0   ;;  %s1175_s14 = smov 0  }
   0x4 LB: > { %s993_s15 = sadd.s32 4294967295, %s1145_s14   ;;  %s994_s16 = sadd.s32 4294967294, %s1145_s14   ;;  %s1145_s14 = sphi %s1175_s14, %s15_s14   ;;  %s1141_s13 = sphi %s1173_s13, %s1938_s13   ;;  %s1137_s12 = sphi %s1171_s12, %s1937_s12   ;;  %s1133_s11 = sphi %s1169_s11, %s1936_s11   ;;  %s1129_s10 = sphi %s1167_s10, %s1935_s10   ;;  %s1125_s9 = sphi %s1165_s9, %s1934_s9  }
   0x5   : > { %s27_s17 = sadd.s32 1, %s1141_s13  ;;  %s85_s18 = sadd.s32 1, %s1133_s11 }
   0x6   : > { %p29_p0 = scmp.ge.s32.totalorder %s27_s17, 2  ;;  %p95_p1 = scmp.ne.s32.totalorder %s1133_s11, %s1129_s10 }
   0x7   : > { %p96_p2 = scmp.eq.s32.totalorder %s993_s15, 1  ;;  %p101_p3 = scmp.ne.s32.totalorder %s1129_s10, %s1125_s9 }
   0x8   : > { %s1940_s17 = smov (%p29_p0, %s27_s17), 0  ;;  %p102_p5 = scmp.eq.s32.totalorder %s994_s16, 1 }
   0x9   : > { %p1205_p4 = por %p96_p2, %p95_p1  ;;  %s80_s20 = ssub.s32 %s1141_s13, %s1940_s17 }
   0xa   : > { %p997_p6 = scmp.ge.s32.totalorder %s1145_s14, 1  ;;  %p83_p7 = scmp.eq.s32.totalorder %s80_s20, 0 }
   0xb   : > { %p1212_p8 = por %p102_p5, %p101_p3  ;;  %p135_p9 = scmp.lt.s32.totalorder %s1145_s14, 3 }
   0xc   : > { %s1218_s22 = scalar_select %p83_p7, %s1133_s11, %s85_s18  }
   0xd   : > { %p136_p10 = pnand %p997_p6, %p135_p9 }
   0xf   : > { %139 = sbr.rel (%p136_p10) target bundleno = 265 (0x109), region = 28 }
  0x14   : > { %v186_v0 = vld [vmem:[%s1876_s1 + $0x78] sm:$0xff]  ;;  %v185_v1 = vld [vmem:[%s1876_s1 + $0x70] sm:$0xff]  ;;  %v184_v2 = vld [vmem:[%s1876_s1 + $0x68] sm:$0xff]  ;;  %p161_p11 = scmp.lt.s32.totalorder %s1137_s12, 1  ;;  %s158_s16 = sand.u32 1, %s1129_s10   ;;  %vm891_vm0 = vcmask 519168  }
  0x15   : > { %v1230_v3 = vand.u32 4294901760, %v186_v0  ;;  %v1232_v4 = vand.u32 4294901760, %v185_v1  ;;  %v1234_v5 = vand.u32 4294901760, %v184_v2  ;;  %v183_v6 = vld [vmem:[%s1876_s1 + $0x60] sm:$0xff]  ;;  %v182_v7 = vld [vmem:[%s1876_s1 + $0x58] sm:$0xff]  ;;  %v181_v8 = vld [vmem:[%s1876_s1 + $0x50] sm:$0xff] }
  0x16   : > { %v1245_v9 = vand.u32 4294901760, %v183_v6  ;;  %v1247_v10 = vand.u32 4294901760, %v182_v7  ;;  %v1249_v11 = vand.u32 4294901760, %v181_v8  ;;  %v180_v12 = vld [vmem:[%s1876_s1 + $0x48] sm:$0xff]  ;;  %v179_v13 = vld [vmem:[%s1876_s1 + $0x40] sm:$0xff]  ;;  %v178_v18 = vld [vmem:[%s1876_s1 + $0x38] sm:$0xff] }
  0x17   : > { %210 = vmatpush.msra.mxu0 %v1230_v3  ;;  %v1259_v14 = vsub.f32 %v186_v0, %v1230_v3  ;;  %v1262_v15 = vsub.f32 %v185_v1, %v1232_v4  ;;  %406 = vmatpush.msra.mxu3 %v1230_v3  ;;  %v1266_v16 = vsub.f32 %v184_v2, %v1234_v5  ;;  %v1268_v17 = vand.u32 4294901760, %v180_v12  ;;  %s1285_s23 = scalar_select %p161_p11, %s1137_s12, 1  ;;  %v177_v26 = vld [vmem:[%s1876_s1 + $0x30] sm:$0xff]  ;;  %v176_v34 = vld [vmem:[%s1876_s1 + $0x28] sm:$0xff]  ;;  %v175_v42 = vld [vmem:[%s1876_s1 + $0x20] sm:$0xff] }
  0x18   : > { %v1274_v19 = vsub.f32 %v183_v6, %v1245_v9  ;;  %v1277_v20 = vsub.f32 %v182_v7, %v1247_v10  ;;  %v1280_v21 = vsub.f32 %v181_v8, %v1249_v11  ;;  %v1292_v25 = vand.u32 4294901760, %v179_v13  ;;  %v174_v48 = vld [vmem:[%s1876_s1 + $0x18] sm:$0xff]  ;;  %v173_v54 = vld [vmem:[%s1876_s1 + $0x10] sm:$0xff]  ;;  %v172_v62 = vld [vmem:[%s1876_s1 + $0x8] sm:$0xff]  ;;  %s998_s18 = sshll.u32 %s158_s16, 3 }
  0x19   : > { %212 = vmatpush.msra.mxu0 %v1232_v4  ;;  %353 = vmatpush.msra.mxu2 %v1259_v14  ;;  %v252_v22 = vand.u32 4294901760, %v1259_v14  ;;  %v1893_v23 = vand.u32 4294901760, %v1262_v15  ;;  %v1891_v24 = vand.u32 4294901760, %v1266_v16  ;;  %v1299_v28 = vand.u32 4294901760, %v178_v18  ;;  %s1007_s28 = sshll.u32 %s1285_s23, 3  ;;  %v202_v60 = vld [vmem:[%s1876_s1 + $0xf8] sm:$0xff] }
  0x1a   : > { %408 = vmatpush.msra.mxu3 %v1232_v4  ;;  %v1889_v27 = vand.u32 4294901760, %v1274_v19  ;;  %v1302_v29 = vsub.f32 %v180_v12, %v1268_v17  ;;  %v1887_v33 = vand.u32 4294901760, %v1277_v20  ;;  %v1320_v35 = vand.u32 4294901760, %v177_v26  ;;  %s169_s5 = scalar_lea.vmem %s1875_s0, %s1007_s28  ;;  %v171_v6 = vld [vmem:[%s1876_s1] sm:$0xff]  ;;  %v201_v7 = vld [vmem:[%s1876_s1 + $0xf0] sm:$0xff]  ;;  %s160_s20 = scalar_lea.vmem [#allocation2], %s998_s18 }
  0x1b   : > { %214 = vmatpush.msra.mxu0 %v1234_v5  ;;  %356 = vmatpush.msra.mxu2 %v1262_v15  ;;  %v253_v30 = vsub.f32 %v1259_v14, %v252_v22  ;;  %v259_v31 = vsub.f32 %v1262_v15, %v1893_v23  ;;  %v265_v32 = vsub.f32 %v1266_v16, %v1891_v24  ;;  %v1886_v36 = vand.u32 4294901760, %v1280_v21  ;;  %v170_v55 = vld [vmem:[%s169_s5] sm:$0xff]  ;;  %s1008_s23 = sshll.u32 %s1137_s12, 3  ;;  %s909_s27 = sshll.u32 %s160_s20, 4  ;;  %s910_s27 = int_to_ptr.vmem [resolvable:$true] %s909_s27 }
  0x1c   : > { %410 = vmatpush.msra.mxu3 %v1234_v5  ;;  %v271_v39 = vsub.f32 %v1274_v19, %v1889_v27  ;;  %v1330_v40 = vsub.f32 %v179_v13, %v1292_v25  ;;  %v1333_v41 = vand.u32 4294901760, %v176_v34  ;;  %v277_v44 = vsub.f32 %v1277_v20, %v1887_v33  ;;  %204 = vst [vmem:[#allocation1] ss:$2 sm:$0xff] %v170_v55  ;;  %s908_s26 = scalar_lea.hbm %s1877_s2, %s1008_s23  ;;  %s896_s12 = scalar_lea.sflag [#allocation3], %s158_s16 }
  0x1d   : > { %216 = vmatpush.msra.mxu0 %v1245_v9  ;;  %v254_v37 = vand.u32 4294901760, %v253_v30  ;;  %359 = vmatpush.msra.mxu2 %v1266_v16  ;;  %v260_v38 = vand.u32 4294901760, %v259_v31  ;;  %v266_v43 = vand.u32 4294901760, %v265_v32  ;;  %v1884_v45 = vand.u32 4294901760, %v1302_v29  ;;  %s911_s28 = sshll.u32 %s908_s26, 4  ;;  %s1087_s5 = scalar_lea.hbm %s1877_s2, 16  ;;  %s912_s28 = int_to_ptr.hbm [resolvable:$true] %s911_s28 }
  0x1e   : > { %412 = vmatpush.msra.mxu3 %v1245_v9  ;;  %v1344_v46 = vsub.f32 %v178_v18, %v1299_v28  ;;  %v283_v47 = vsub.f32 %v1280_v21, %v1886_v36  ;;  %v272_v49 = vand.u32 4294901760, %v271_v39  ;;  %v1358_v50 = vand.u32 4294901760, %v175_v42  ;;  %s1081_s29 = sshra.s32 %s912_s28, 4  ;;  %s1082_s29 = int_to_ptr.hbm [resolvable:$true] %s1081_s29 }
  0x1f   : > { %218 = vmatpush.msra.mxu0 %v1247_v10  ;;  %255 = vmatpush.msra.mxu1 %v254_v37  ;;  %v1883_v51 = vand.u32 4294901760, %v1330_v40  ;;  %v1362_v52 = vsub.f32 %v177_v26, %v1320_v35  ;;  %v1367_v53 = vsub.f32 %v176_v34, %v1333_v41  ;;  %v278_v56 = vand.u32 4294901760, %v277_v44  ;;  %v200_v34 = vld [vmem:[%s1876_s1 + $0xe8] sm:$0xff]  ;;  %s1083_s30 = scalar_lea.hbm %s1082_s29, 8  ;;  %p1088_p1 = scmp.lt.s32.totalorder %s1082_s29, %s1877_s2 }
  0x20   : > { %362 = vmatpush.msra.mxu2 %v1274_v19  ;;  %414 = vmatpush.msra.mxu3 %v1247_v10  ;;  %v289_v57 = vsub.f32 %v1302_v29, %v1884_v45  ;;  %v1376_v58 = vand.u32 4294901760, %v174_v48  ;;  %v1882_v59 = vand.u32 4294901760, %v1344_v46  ;;  %v284_v61 = vand.u32 4294901760, %v283_v47  ;;  %v199_v47 = vld [vmem:[%s1876_s1 + $0xe0] sm:$0xff]  ;;  %p1084_p12 = scmp.ne.s32.totalorder %s1082_s29, %s1083_s30  ;;  %p1089_p2 = scmp.lt.s32.totalorder %s1087_s5, %s1083_s30 }
  0x21   : > { %220 = vmatpush.msra.mxu0 %v1249_v11  ;;  %261 = vmatpush.msra.mxu1 %v260_v38  ;;  %v295_v63 = vsub.f32 %v1330_v40, %v1883_v51  ;;  %v1391_v0 = vand.u32 4294901760, %v173_v54  ;;  %v1880_v1 = vand.u32 4294901760, %v1362_v52  ;;  %v1395_v2 = vsub.f32 %v175_v42, %v1358_v50  ;;  %v195_v45 = vld [vmem:[%s1876_s1 + $0xc0] sm:$0xff] }
  0x22   : > { %365 = vmatpush.msra.mxu2 %v1277_v20  ;;  %416 = vmatpush.msra.mxu3 %v1249_v11  ;;  %v1879_v8 = vand.u32 4294901760, %v1367_v53  ;;  %v1406_v12 = vand.u32 4294901760, %v202_v60  ;;  %v290_v13 = vand.u32 4294901760, %v289_v57  ;;  %v301_v18 = vsub.f32 %v1344_v46, %v1882_v59  ;;  %p1085_p13 = pnand %p1084_p12, %p1205_p4  ;;  %p1090_p3 = por %p1089_p2, %p1088_p1 }
  0x23   : > { %222 = vmatpush.msra.mxu0 %v1268_v17  ;;  %267 = vmatpush.msra.mxu1 %v266_v43  ;;  %v1412_v26 = vand.u32 4294901760, %v172_v62  ;;  %v1415_v30 = vsub.f32 %v174_v48, %v1376_v58  ;;  %v1419_v31 = vand.u32 4294901760, %v171_v6  ;;  %v1421_v32 = vand.u32 4294901760, %v201_v7 }
  0x24   : > { %368 = vmatpush.msra.mxu2 %v1280_v21  ;;  %418 = vmatpush.msra.mxu3 %v1268_v17  ;;  %v296_v37 = vand.u32 4294901760, %v295_v63  ;;  %v307_v38 = vsub.f32 %v1362_v52, %v1880_v1  ;;  %v1878_v39 = vand.u32 4294901760, %v1395_v2  ;;  %v1432_v42 = vsub.f32 %v173_v54, %v1391_v0  ;;  %p1086_p0 = pneg %p1085_p13 }
  0x25   : > { %224 = vmatpush.msra.mxu0 %v1292_v25  ;;  %273 = vmatpush.msra.mxu1 %v272_v49  ;;  %v313_v43 = vsub.f32 %v1367_v53, %v1879_v8  ;;  %v1440_v44 = vsub.f32 %v202_v60, %v1406_v12  ;;  %v302_v48 = vand.u32 4294901760, %v301_v18  ;;  %v1881_v49 = vand.u32 4294901760, %v1415_v30  ;;  %v198_v60 = vld [vmem:[%s1876_s1 + $0xd8] sm:$0xff]  ;;  %v197_v18 = vld [vmem:[%s1876_s1 + $0xd0] sm:$0xff]  ;;  %v196_v8 = vld [vmem:[%s1876_s1 + $0xc8] sm:$0xff] }
  0x26   : > { %371 = vmatpush.msra.mxu2 %v1302_v29  ;;  %420 = vmatpush.msra.mxu3 %v1292_v25  ;;  %v1448_v54 = vsub.f32 %v172_v62, %v1412_v26  ;;  %v1450_v55 = vand.u32 4294901760, %v200_v34  ;;  %v1458_v57 = vsub.f32 %v201_v7, %v1421_v32  ;;  %v319_v62 = vsub.f32 %v1395_v2, %v1878_v39  ;;  %p1091_p5 = pnand %p1090_p3, %p1086_p0 }
  0x27   : > { %226 = vmatpush.msra.mxu0 %v1299_v28  ;;  %279 = vmatpush.msra.mxu1 %v278_v56  ;;  %v1455_v56 = vsub.f32 %v171_v6, %v1419_v31  ;;  %v1885_v63 = vand.u32 4294901760, %v1432_v42  ;;  %v314_v6 = vand.u32 4294901760, %v313_v43  ;;  %v1888_v7 = vand.u32 4294901760, %v1440_v44 }
  0x28   : > { %374 = vmatpush.msra.mxu2 %v1330_v40  ;;  %422 = vmatpush.msra.mxu3 %v1299_v28  ;;  %1904 = vst [vmem:[#allocation5_spill] sm:$0xff] %v1450_v55  ;;  %v1482_v39 = vsub.f32 %v200_v34, %v1450_v55  ;;  %v1484_v43 = vand.u32 4294901760, %v198_v60  ;;  %v1892_v1 = vand.u32 4294901760, %v1458_v57  ;;  %v1500_v51 = vand.u32 4294901760, %v197_v18 }
  0x29   : > { %228 = vmatpush.msra.mxu0 %v1320_v35  ;;  %285 = vmatpush.msra.mxu1 %v284_v61  ;;  %v308_v61 = vand.u32 4294901760, %v307_v38  ;;  %v1890_v38 = vand.u32 4294901760, %v1448_v54  ;;  %v331_v34 = vsub.f32 %v1432_v42, %v1885_v63  ;;  %v1525_v27 = vand.u32 4294901760, %v195_v45 }
  0x2a   : > { %377 = vmatpush.msra.mxu2 %v1344_v46  ;;  %424 = vmatpush.msra.mxu3 %v1320_v35  ;;  %v1895_v36 = vand.u32 4294901760, %v1482_v39  ;;  %v1518_v33 = vsub.f32 %v198_v60, %v1484_v43  ;;  %v1536_v24 = vsub.f32 %v197_v18, %v1500_v51 }
  0x2b   : > { %230 = vmatpush.msra.mxu0 %v1333_v41  ;;  %291 = vmatpush.msra.mxu1 %v290_v13  ;;  %v1468_v13 = vand.u32 4294901760, %v199_v47  ;;  %v337_v63 = vsub.f32 %v1448_v54, %v1890_v38 }
  0x2c   : > { %380 = vmatpush.msra.mxu2 %v1362_v52  ;;  %426 = vmatpush.msra.mxu3 %v1333_v41  ;;  %v606_v18 = vsub.f32 %v1482_v39, %v1895_v36  ;;  %v1897_v14 = vand.u32 4294901760, %v1518_v33 }
  0x2d   : > { %232 = vmatpush.msra.mxu0 %v1358_v50  ;;  %297 = vmatpush.msra.mxu1 %v296_v37  ;;  %v325_v37 = vsub.f32 %v1415_v30, %v1881_v49  ;;  %v320_v49 = vand.u32 4294901760, %v319_v62  ;;  %v1498_v59 = vsub.f32 %v199_v47, %v1468_v13  ;;  %v1510_v62 = vand.u32 4294901760, %v196_v8 }
  0x2e   : > { %383 = vmatpush.msra.mxu2 %v1367_v53  ;;  %428 = vmatpush.msra.mxu3 %v1358_v50 }
  0x2f   : > { %234 = vmatpush.msra.mxu0 %v1376_v58  ;;  %303 = vmatpush.msra.mxu1 %v302_v48  ;;  %v1894_v48 = vand.u32 4294901760, %v1455_v56  ;;  %v326_v47 = vand.u32 4294901760, %v325_v37  ;;  %v332_v37 = vand.u32 4294901760, %v331_v34  ;;  %v1896_v38 = vand.u32 4294901760, %v1498_v59 }
  0x30   : > { %386 = vmatpush.msra.mxu2 %v1395_v2  ;;  %430 = vmatpush.msra.mxu3 %v1376_v58  ;;  %v1542_v23 = vsub.f32 %v196_v8, %v1510_v62  ;;  %v338_v34 = vand.u32 4294901760, %v337_v63  ;;  %v192_v63 = vld [vmem:[%s1876_s1 + $0xa8] sm:$0xff] }
  0x31   : > { %236 = vmatpush.msra.mxu0 %v1391_v0  ;;  %309 = vmatpush.msra.mxu1 %v308_v61  ;;  %v594_v61 = vsub.f32 %v1440_v44, %v1888_v7  ;;  %v600_v7 = vsub.f32 %v1458_v57, %v1892_v1  ;;  %v343_v60 = vsub.f32 %v1455_v56, %v1894_v48 }
  0x32   : > { %389 = vmatpush.msra.mxu2 %v1415_v30  ;;  %432 = vmatpush.msra.mxu3 %v1391_v0  ;;  %v1558_v48 = vsub.f32 %v195_v45, %v1525_v27  ;;  %v612_v36 = vsub.f32 %v1498_v59, %v1896_v38  ;;  %v618_v38 = vsub.f32 %v1518_v33, %v1897_v14  ;;  %v1908_v14 = vand.u32 4294901760, %v1536_v24 }
  0x33   : > { %238 = vmatpush.msra.mxu0 %v1412_v26  ;;  %315 = vmatpush.msra.mxu1 %v314_v6  ;;  %v194_v6 = vld [vmem:[%s1876_s1 + $0xb8] sm:$0xff]  ;;  %v595_v1 = vand.u32 4294901760, %v594_v61  ;;  %v1905_v61 = vand.u32 4294901760, %v1262_v15  ;;  %v601_v8 = vand.u32 4294901760, %v600_v7  ;;  %v1906_v7 = vand.u32 4294901760, %v1266_v16 }
  0x34   : > { %392 = vmatpush.msra.mxu2 %v1432_v42  ;;  %434 = vmatpush.msra.mxu3 %v1412_v26  ;;  %v1583_v16 = vand.u32 4294901760, %v192_v63 }
  0x35   : > { %240 = vmatpush.msra.mxu0 %v1419_v31  ;;  %321 = vmatpush.msra.mxu1 %v320_v49  ;;  %v193_v49 = vld [vmem:[%s1876_s1 + $0xb0] sm:$0xff] }
  0x36   : > { %395 = vmatpush.msra.mxu2 %v1448_v54  ;;  %436 = vmatpush.msra.mxu3 %v1419_v31 }
  0x37   : > { %447 = vmatpush.msrb.mxu0 %v252_v22  ;;  %327 = vmatpush.msra.mxu1 %v326_v47  ;;  %v1552_v22 = vand.u32 4294901760, %v194_v6  ;;  %v344_v47 = vand.u32 4294901760, %v343_v60  ;;  %v607_v60 = vand.u32 4294901760, %v606_v18  ;;  %v613_v18 = vand.u32 4294901760, %v612_v36 }
  0x38   : > { %398 = vmatpush.msra.mxu2 %v1455_v56  ;;  %596 = vmatpush.msrb.mxu3 %v595_v1  ;;  %v1907_v1 = vand.u32 4294901760, %v1274_v19  ;;  %v619_v36 = vand.u32 4294901760, %v618_v38  ;;  %v189_v38 = vld [vmem:[%s1876_s1 + $0x90] sm:$0xff] }
  0x39   : > { %451 = vmatpush.msrb.mxu0 %v1905_v61  ;;  %333 = vmatpush.msra.mxu1 %v332_v37  ;;  %v1568_v61 = vand.u32 4294901760, %v193_v49  ;;  %v191_v37 = vld [vmem:[%s1876_s1 + $0xa0] sm:$0xff]  ;;  %v1581_v15 = vsub.f32 %v194_v6, %v1552_v22  ;;  %v624_v6 = vsub.f32 %v1536_v24, %v1908_v14 }
  0x3a   : > { %551 = vmatpush.msrb.mxu2 %v1406_v12  ;;  %602 = vmatpush.msrb.mxu3 %v601_v8  ;;  %v1598_v19 = vand.u32 4294901760, %v191_v37  ;;  %v1909_v8 = vand.u32 4294901760, %v1277_v20  ;;  %v1911_v20 = vand.u32 4294901760, %v1280_v21 }
  0x3b   : > { %455 = vmatpush.msrb.mxu0 %v1906_v7  ;;  %339 = vmatpush.msra.mxu1 %v338_v34  ;;  %v190_v34 = vld [vmem:[%s1876_s1 + $0x98] sm:$0xff]  ;;  %v1596_v45 = vsub.f32 %v193_v49, %v1568_v61  ;;  %v205_v7 = vld.sshfl [vmem:[#allocation1] sm:$0xff pattern:$0x75316420]  ;;  %v1900_v14 = vand.u32 4294901760, %v1581_v15  ;;  %v1609_v49 = vsub.f32 %v192_v63, %v1583_v16  ;;  %v625_v63 = vand.u32 4294901760, %v624_v6 }
  0x3c   : > { %553 = vmatpush.msrb.mxu2 %v1421_v32  ;;  %608 = vmatpush.msrb.mxu3 %v607_v60  ;;  %v1627_v21 = vand.u32 4294901760, %v205_v7  ;;  %v1640_v6 = vand.u32 4294901760, %v189_v38 }
  0x3d   : > { %459 = vmatpush.msrb.mxu0 %v1907_v1  ;;  %345 = vmatpush.msra.mxu1 %v344_v47  ;;  %v1910_v1 = vand.u32 4294901760, %v1542_v23  ;;  %v1901_v60 = vand.u32 4294901760, %v1596_v45 }
  0x3e   : > { %555 = vmatpush.msrb.mxu2 %v1450_v55  ;;  %v1611_v55 = vand.u32 4294901760, %v190_v34  ;;  %614 = vmatpush.msrb.mxu3 %v613_v18  ;;  %v653_v18 = vand.u32 4294901760, %v1609_v49 }
  0x3f   : > { %463 = vmatpush.msrb.mxu0 %v1909_v8  ;;  %514 = vmatpush.msrb.mxu1 %v1230_v3  ;;  %v630_v47 = vsub.f32 %v1542_v23, %v1910_v1  ;;  %v1912_v3 = vand.u32 4294901760, %v1558_v48  ;;  %v1625_v1 = vsub.f32 %v191_v37, %v1598_v19  ;;  %v642_v37 = vsub.f32 %v1581_v15, %v1900_v14 }
  0x40   : > { %557 = vmatpush.msrb.mxu2 %v1468_v13  ;;  %620 = vmatpush.msrb.mxu3 %v619_v36  ;;  %v648_v36 = vsub.f32 %v1596_v45, %v1901_v60  ;;  %v1654_v14 = vsub.f32 %v205_v7, %v1627_v21  ;;  %v654_v7 = vsub.f32 %v1609_v49, %v653_v18  ;;  %v1916_v60 = vand.u32 4294901760, %v1362_v52 }
  0x41   : > { %467 = vmatpush.msrb.mxu0 %v1911_v20  ;;  %516 = vmatpush.msrb.mxu1 %v1232_v4  ;;  %v636_v8 = vsub.f32 %v1558_v48, %v1912_v3  ;;  %v1913_v4 = vand.u32 4294901760, %v1302_v29  ;;  %v631_v20 = vand.u32 4294901760, %v630_v47  ;;  %v188_v3 = vld [vmem:[%s1876_s1 + $0x88] sm:$0xff]  ;;  %v1643_v29 = vsub.f32 %v190_v34, %v1611_v55 }
  0x42   : > { %559 = vmatpush.msrb.mxu2 %v1484_v43  ;;  %626 = vmatpush.msrb.mxu3 %v625_v63  ;;  %v1656_v34 = vand.u32 4294901760, %v188_v3  ;;  %v1917_v52 = vand.u32 4294901760, %v1367_v53 }
  0x43   : > { %471 = vmatpush.msrb.mxu0 %v1913_v4  ;;  %518 = vmatpush.msrb.mxu1 %v1234_v5  ;;  %v1914_v5 = vand.u32 4294901760, %v1330_v40  ;;  %v637_v47 = vand.u32 4294901760, %v636_v8  ;;  %v659_v4 = vand.u32 4294901760, %v1625_v1  ;;  %v187_v40 = vld [vmem:[%s1876_s1 + $0x80] sm:$0xff]  ;;  %v643_v8 = vand.u32 4294901760, %v642_v37 }
  0x44   : > { %561 = vmatpush.msrb.mxu2 %v1500_v51  ;;  %632 = vmatpush.msrb.mxu3 %v631_v20  ;;  %v665_v63 = vand.u32 4294901760, %v1643_v29  ;;  %v243_v37 = vand.u32 4294901760, %v1654_v14 }
  0x45   : > { %475 = vmatpush.msrb.mxu0 %v1914_v5  ;;  %520 = vmatpush.msrb.mxu1 %v1245_v9  ;;  %v1915_v9 = vand.u32 4294901760, %v1344_v46  ;;  %v1670_v5 = vsub.f32 %v189_v38, %v1640_v6  ;;  %v1675_v46 = vand.u32 4294901760, %v187_v40  ;;  %v660_v20 = vsub.f32 %v1625_v1, %v659_v4 }
  0x46   : > { %563 = vmatpush.msrb.mxu2 %v1510_v62  ;;  %638 = vmatpush.msrb.mxu3 %v637_v47  ;;  %v1683_v38 = vsub.f32 %v188_v3, %v1656_v34  ;;  %v666_v47 = vsub.f32 %v1643_v29, %v665_v63  ;;  %v244_v3 = vsub.f32 %v1654_v14, %v243_v37 }
  0x47   : > { %479 = vmatpush.msrb.mxu0 %v1915_v9  ;;  %522 = vmatpush.msrb.mxu1 %v1247_v10  ;;  %v649_v10 = vand.u32 4294901760, %v648_v36  ;;  %v671_v36 = vand.u32 4294901760, %v1670_v5  ;;  %v1918_v9 = vand.u32 4294901760, %v1395_v2  ;;  %v1697_v53 = vsub.f32 %v187_v40, %v1675_v46 }
  0x48   : > { %565 = vmatpush.msrb.mxu2 %v1525_v27  ;;  %644 = vmatpush.msrb.mxu3 %v643_v8  ;;  %v677_v8 = vand.u32 4294901760, %v1683_v38  ;;  %v1920_v40 = vand.u32 4294901760, %v1432_v42  ;;  %v1922_v42 = vand.u32 4294901760, %v1455_v56 }
  0x49   : > { %483 = vmatpush.msrb.mxu0 %v1916_v60  ;;  %524 = vmatpush.msrb.mxu1 %v1249_v11  ;;  %v206_v11 = vld.sshfl [vmem:[#allocation1 + $0x8] sm:$0xff pattern:$0x75316420]  ;;  %v655_v60 = vand.u32 4294901760, %v654_v7  ;;  %v672_v2 = vsub.f32 %v1670_v5, %v671_v36 }
  0x4a   : > { %567 = vmatpush.msrb.mxu2 %v1552_v22  ;;  %650 = vmatpush.msrb.mxu3 %v649_v10  ;;  %v1702_v7 = vand.u32 4294901760, %v206_v11  ;;  %v683_v10 = vand.u32 4294901760, %v1697_v53 }
  0x4b   : > { %487 = vmatpush.msrb.mxu0 %v1917_v52  ;;  %526 = vmatpush.msrb.mxu1 %v1268_v17  ;;  %v661_v17 = vand.u32 4294901760, %v660_v20  ;;  %v1919_v52 = vand.u32 4294901760, %v1415_v30  ;;  %v245_v30 = vand.u32 4294901760, %v244_v3 }
  0x4c   : > { %569 = vmatpush.msrb.mxu2 %v1568_v61  ;;  %656 = vmatpush.msrb.mxu3 %v655_v60  ;;  %v1720_v20 = vsub.f32 %v206_v11, %v1702_v7  ;;  %v1921_v60 = vand.u32 4294901760, %v1448_v54 }
  0x4d   : > { %491 = vmatpush.msrb.mxu0 %v1918_v9  ;;  %528 = vmatpush.msrb.mxu1 %v1292_v25  ;;  %v667_v25 = vand.u32 4294901760, %v666_v47  ;;  %v684_v47 = vsub.f32 %v1697_v53, %v683_v10 }
  0x4e   : > { %571 = vmatpush.msrb.mxu2 %v1583_v16  ;;  %662 = vmatpush.msrb.mxu3 %v661_v17  ;;  %v584_v11 = vand.u32 4294901760, %v1720_v20 }
  0x4f   : > { %495 = vmatpush.msrb.mxu0 %v1919_v52  ;;  %530 = vmatpush.msrb.mxu1 %v1299_v28  ;;  %v678_v28 = vsub.f32 %v1683_v38, %v677_v8 }
  0x50   : > { %573 = vmatpush.msrb.mxu2 %v1598_v19  ;;  %668 = vmatpush.msrb.mxu3 %v667_v25 }
  0x51   : > { %499 = vmatpush.msrb.mxu0 %v1920_v40  ;;  %532 = vmatpush.msrb.mxu1 %v1320_v35  ;;  %v673_v35 = vand.u32 4294901760, %v672_v2  ;;  %v679_v54 = vand.u32 4294901760, %v678_v28 }
  0x52   : > { %575 = vmatpush.msrb.mxu2 %v1611_v55  ;;  %246 = vmatmul.f32.vlgmr.msra.gmra.mxu0 %v245_v30 }
  0x53   : > { %503 = vmatpush.msrb.mxu0 %v1921_v60  ;;  %534 = vmatpush.msrb.mxu1 %v1333_v41  ;;  %v685_v41 = vand.u32 4294901760, %v684_v47 }
  0x54   : > { %577 = vmatpush.msrb.mxu2 %v1640_v6  ;;  %674 = vmatpush.msrb.mxu3 %v673_v35 }
  0x55   : > { %507 = vmatpush.msrb.mxu0 %v1922_v42  ;;  %536 = vmatpush.msrb.mxu1 %v1358_v50  ;;  %v585_v50 = vsub.f32 %v1720_v20, %v584_v11 }
  0x56   : > { %579 = vmatpush.msrb.mxu2 %v1656_v34  ;;  %680 = vmatpush.msrb.mxu3 %v679_v54 }
  0x57   : > { %694 = vmatpush.msra.mxu0 %v1440_v44  ;;  %538 = vmatpush.msrb.mxu1 %v1376_v58  ;;  %v1923_v58 = vand.u32 4294901760, %v1440_v44  ;;  %v586_v56 = vand.u32 4294901760, %v585_v50  ;;  %v1925_v44 = vand.u32 4294901760, %v1482_v39 }
  0x58   : > { %401 = vmatmul.f32.vlgmr.msra.gmra.mxu2 %v1654_v14  ;;  %440 = vmatmul.f32.vlgmr.msra.gmra.mxu3 %v243_v37 }
  0x59   : > { %697 = vmatpush.msra.mxu0 %v1458_v57  ;;  %540 = vmatpush.msrb.mxu1 %v1391_v0  ;;  %v1924_v0 = vand.u32 4294901760, %v1458_v57  ;;  %v1927_v57 = vld [vmem:[#allocation5_spill] sm:$0xff] }
  0x5a   : > { %581 = vmatpush.msrb.mxu2 %v1675_v46  ;;  %686 = vmatpush.msrb.mxu3 %v685_v41 }
  0x5b   : > { %700 = vmatpush.msra.mxu0 %v1482_v39  ;;  %542 = vmatpush.msrb.mxu1 %v1412_v26  ;;  %v1926_v26 = vand.u32 4294901760, %v1498_v59 }
  0x5c   : > { %788 = vmatpush.msra.mxu2 %v1923_v58  ;;  %347 = vmatmul.f32.vlgmr.msra.gmra.mxu1 %v1627_v21 }
  0x5d   : > { %703 = vmatpush.msra.mxu0 %v1498_v59  ;;  %855 = vmatpush.msra.mxu3 %v1406_v12  ;;  %v1929_v59 = vand.u32 4294901760, %v1536_v24 }
  0x5e   : > { %792 = vmatpush.msra.mxu2 %v1924_v0  ;;  %544 = vmatpush.msrb.mxu1 %v1419_v31  ;;  %v1931_v31 = vand.u32 4294901760, %v1558_v48 }
  0x5f   : > { %706 = vmatpush.msra.mxu0 %v1518_v33  ;;  %857 = vmatpush.msra.mxu3 %v1421_v32 }
  0x60   : > { %747 = vmatpush.msra.mxu1 %v1406_v12  ;;  %796 = vmatpush.msra.mxu2 %v1925_v44  ;;  %v1928_v12 = vand.u32 4294901760, %v1518_v33  ;;  %v1930_v33 = vand.u32 4294901760, %v1542_v23 }
  0x61   : > { %587 = vmatmul.f32.vlgmr.msrb.gmra.mxu2 %v586_v56  ;;  %709 = vmatpush.msra.mxu0 %v1536_v24  ;;  %v1932_v24 = vand.u32 4294901760, %v1581_v15 }
  0x62   : > { %749 = vmatpush.msra.mxu1 %v1421_v32  ;;  %800 = vmatpush.msra.mxu2 %v1926_v26 }
  0x63   : > { %859 = vmatpush.msra.mxu3 %v1927_v57  ;;  %509 = vmatmul.f32.vlgmr.msrb.gmra.mxu0 %v1627_v21 }
  0x64   : > { %688 = vmatmul.f32.vlgmr.msrb.gmra.mxu3 %v1702_v7  ;;  %712 = vmatpush.msra.mxu0 %v1542_v23  ;;  %v1933_v23 = vand.u32 4294901760, %v1596_v45 }
  0x65   : > { %751 = vmatpush.msra.mxu1 %v1927_v57  ;;  %804 = vmatpush.msra.mxu2 %v1928_v12 }
  0x66   : > { %861 = vmatpush.msra.mxu3 %v1468_v13  ;;  %546 = vmatmul.f32.vlgmr.msrb.gmra.mxu1 %v1627_v21 }
  0x67   : > { %715 = vmatpush.msra.mxu0 %v1558_v48  ;;  %753 = vmatpush.msra.mxu1 %v1468_v13 }
  0x68   : > { %808 = vmatpush.msra.mxu2 %v1929_v59  ;;  %863 = vmatpush.msra.mxu3 %v1484_v43 }
  0x69   : > { %718 = vmatpush.msra.mxu0 %v1581_v15  ;;  %755 = vmatpush.msra.mxu1 %v1484_v43 }
  0x6a   : > { %812 = vmatpush.msra.mxu2 %v1930_v33  ;;  %865 = vmatpush.msra.mxu3 %v1500_v51 }
  0x6b   : > { %721 = vmatpush.msra.mxu0 %v1596_v45  ;;  %757 = vmatpush.msra.mxu1 %v1500_v51 }
  0x6c   : > { %816 = vmatpush.msra.mxu2 %v1931_v31  ;;  %867 = vmatpush.msra.mxu3 %v1510_v62 }
  0x6d   : > { %724 = vmatpush.msra.mxu0 %v1609_v49  ;;  %759 = vmatpush.msra.mxu1 %v1510_v62 }
  0x6e   : > { %820 = vmatpush.msra.mxu2 %v1932_v24  ;;  %869 = vmatpush.msra.mxu3 %v1525_v27 }
  0x6f   : > { %727 = vmatpush.msra.mxu0 %v1625_v1  ;;  %761 = vmatpush.msra.mxu1 %v1525_v27 }
  0x70   : > { %824 = vmatpush.msra.mxu2 %v1933_v23  ;;  %871 = vmatpush.msra.mxu3 %v1552_v22 }
  0x71   : > { %730 = vmatpush.msra.mxu0 %v1643_v29  ;;  %763 = vmatpush.msra.mxu1 %v1552_v22 }
  0x72   : > { %828 = vmatpush.msra.mxu2 %v653_v18  ;;  %873 = vmatpush.msra.mxu3 %v1568_v61 }
  0x73   : > { %733 = vmatpush.msra.mxu0 %v1670_v5  ;;  %765 = vmatpush.msra.mxu1 %v1568_v61 }
  0x74   : > { %832 = vmatpush.msra.mxu2 %v659_v4  ;;  %875 = vmatpush.msra.mxu3 %v1583_v16 }
  0x75   : > { %736 = vmatpush.msra.mxu0 %v1683_v38  ;;  %767 = vmatpush.msra.mxu1 %v1583_v16 }
  0x76   : > { %836 = vmatpush.msra.mxu2 %v665_v63  ;;  %877 = vmatpush.msra.mxu3 %v1598_v19 }
  0x77   : > { %739 = vmatpush.msra.mxu0 %v1697_v53  ;;  %769 = vmatpush.msra.mxu1 %v1598_v19 }
  0x78   : > { %840 = vmatpush.msra.mxu2 %v671_v36  ;;  %879 = vmatpush.msra.mxu3 %v1611_v55 }
  0x79   : > { %742 = vmatmul.f32.vlgmr.msra.gmra.mxu0 %v1720_v20  ;;  %771 = vmatpush.msra.mxu1 %v1611_v55  ;;  %v1147_v55 = vmov 0.0  }
  0x7a   : > { %844 = vmatpush.msra.mxu2 %v677_v8  ;;  %881 = vmatpush.msra.mxu3 %v1640_v6  ;;  %1001 = vst.msk [vmem:[%s160_s20 + $0x4] sm:$0xf] %vm891_vm0, %v1147_v55 }
  0x7b   : > { %773 = vmatpush.msra.mxu1 %v1640_v6 }
  0x7c   : > { %848 = vmatpush.msra.mxu2 %v683_v10  ;;  %883 = vmatpush.msra.mxu3 %v1656_v34 }
  0x7d   : > { %850 = vmatmul.f32.vlgmr.msra.gmra.mxu2 %v1702_v7  ;;  %775 = vmatpush.msra.mxu1 %v1656_v34 }
  0x7e   : > { %885 = vmatpush.msra.mxu3 %v1675_v46 }
  0x7f   : > { %887 = vmatmul.f32.vlgmr.msra.gmra.mxu3 %v1702_v7  ;;  %777 = vmatpush.msra.mxu1 %v1675_v46 }
  0x80   : > { %781 = vmatmul.f32.vlgmr.msra.gmra.mxu1 %v584_v11 }
  0xcf   : > { %v247_v51 = vpop.f32.mrf.mxu0 }
  0xd9   : > { %v348_v27 = vpop.f32.mrf.mxu1 }
  0xda   : > { %v349_v32 = vadd.f32 %v348_v27, %v247_v51 }
  0xdb   : > { %v402_v39 = vpop.f32.mrf.mxu2  ;;  %v441_v43 = vpop.f32.mrf.mxu3 }
  0xdc   : > { %v403_v13 = vadd.f32 %v402_v39, %v349_v32 }
  0xde   : > { %v442_v48 = vadd.f32 %v441_v43, %v403_v13 }
  0xe0   : > { %v510_v62 = vpop.f32.mrf.mxu0 }
  0xe1   : > { %v511_v22 = vadd.f32 %v510_v62, %v442_v48 }
  0xe3   : > { %v547_v15 = vpop.f32.mrf.mxu1 }
  0xe4   : > { %v548_v61 = vadd.f32 %v547_v15, %v511_v22  ;;  %v588_v45 = vpop.f32.mrf.mxu2 }
  0xe6   : > { %v589_v16 = vadd.f32 %v588_v45, %v548_v61 }
  0xe7   : > { %v689_v19 = vpop.f32.mrf.mxu3 }
  0xe8   : > { %v690_v49 = vadd.f32 %v689_v19, %v589_v16 }
  0xf6   : > { %v743_v14 = vpop.f32.mrf.mxu0 }
  0xf7   : > { %v744_v1 = vadd.f32 %v743_v14, %v690_v49 }
  0xfd   : > { %v782_v21 = vpop.f32.mrf.mxu1 }
  0xfe   : > { %v783_v18 = vadd.f32 %v782_v21, %v744_v1 }
 0x100   : > { %v851_v6 = vpop.f32.mrf.mxu2 }
 0x101   : > { %v852_v29 = vadd.f32 %v851_v6, %v783_v18 }
 0x102   : > { %v888_v4 = vpop.f32.mrf.mxu3 }
 0x103   : > { %v889_v34 = vadd.f32 %v888_v4, %v852_v29 }
 0x105   : > { %892 = vst.msk [vmem:[%s160_s20] sm:$0xf] %vm891_vm0, %v889_v34 }
 0x106   : > { %1094 = shalt.err (!%p1091_p5)
}
 0x107   : > { %s1148_s8 = smov 64   ;;  %s1149_s15 = smov 4  }
 0x108   : > { %1009 = dma.vmem_to_hbm [thread:$0]  (%p1205_p4), %s910_s27, 128, %s912_s28, %s896_s12, %s1148_s8, %s1148_s8, %s1149_s15  }
 0x109 PF: > { %p1015_p6 = scmp.ge.s32.totalorder %s1145_s14, 2  ;;  %s926_s16 = sand.u32 1, %s1125_s9  }
 0x10a   : > { %s927_s18 = scalar_lea.sflag [#allocation3], %s926_s16 }
 0x10b   : > { %p1012_p7 = pnand %p1015_p6, %p1212_p8 }
 0x10d   : > { %p1013_p9 = pneg %p1012_p7 }
 0x10f   : > { %1120 = dma.done.wait (%p1013_p9), %s927_s18, 128  }
 0x110   : > { %1122 = vsyncadd (%p1013_p9), %s927_s18, 4294967168  ;;  %s15_s14 = sadd.s32 1, %s1145_s14   ;;  %s1934_s9 = smov %s1129_s10 }
 0x111   : > { %p12_p10 = scmp.ge.s32.totalorder %s15_s14, 4   ;;  %s1935_s10 = smov %s1133_s11 }
 0x112   : > { %s1936_s11 = smov %s1218_s22  ;;  %s1937_s12 = smov %s1141_s13 }
 0x113   : > { %s1938_s13 = smov %s1940_s17  ;;  %14 = sbr.rel (!%p12_p10) target bundleno = 4 (0x4), region = 64 }
 0x118   :  { %933 = vsyncpa [#allocation3], 1 }
 0x119   :  { %935 = vsyncpa [#allocation3 + $0x1], 1 }

</bundles_post_ra>
